<compile_context>
chip_gen: v5e
topology: v5e:2x2
jax: 0.10.0
libtpu: 0.0.40
codegen_flags: <defaults>
</compile_context>

<pallas_src>
import jax
import jax.numpy as jnp
from jax.experimental import pallas as pl
from jax.experimental.pallas import tpu as pltpu


NEG_SLOPE = 0.01      # F.leaky_relu default negative_slope
LANE = 128            # lane width used for the in-kernel intermediate only


def _round_up(a, m):
    return ((a + m - 1) // m) * m


def _specformer_kernel(x_ref, w4t_ref, b4_ref, w56t_ref, b56_ref, out_ref):
    """Fused fc4 -> leaky_relu -> (fc6∘fc5 folded) on one batch tile.

    x_ref:    (TB, hidden)      f32   streamed batch tile
    w4t_ref:  (hidden, LANE)    f32   (= W4.T, zero-padded columns)  resident
    b4_ref:   (1, LANE)         f32   (zero-padded)                  resident
    w56t_ref: (LANE, n_out)     f32   (= (W6 @ W5).T, zero-pad rows) resident
    b56_ref:  (1, n_out)        f32                                  resident
    out_ref:  (TB, n_out)       f32   HBM-facing output (no padding)
    """
    x = x_ref[...]
    # fc4: (TB, hidden) @ (hidden, LANE) + b4 ; padded lanes stay exactly 0.
    h = jnp.dot(x, w4t_ref[...], preferred_element_type=jnp.float32)
    h = h + b4_ref[...]
    # leaky_relu (leaky_relu(0) == 0 so padded lanes remain 0)
    h = jnp.where(h > 0, h, NEG_SLOPE * h)
    # folded fc6(fc5(.)): (TB, LANE) @ (LANE, n_out) + b56 ; padded rows of
    # w56t are zero so padded lanes of h contribute nothing.
    o = jnp.dot(h, w56t_ref[...], preferred_element_type=jnp.float32)
    o = o + b56_ref[...]
    out_ref[...] = o.astype(out_ref.dtype)


def _resident_spec(shape):
    """Constant-index (VMEM-resident) operand; single-buffered when supported."""
    idx = lambda i: (0,) * len(shape)
    try:
        return pl.BlockSpec(shape, idx, pipeline_mode=pl.Buffered(1))
    except (TypeError, AttributeError):
        # TODO(synk): Pallas version without pipeline_mode; default buffering.
        return pl.BlockSpec(shape, idx)


def _derive_tile(B, hidden, n_out, max_tb):
    """Pick TB from an explicit VMEM budget and return (TB, vmem_limit_bytes)."""
    hid_lanes = _round_up(hidden, LANE)      # VMEM lane padding of the x tile
    out_lanes = _round_up(n_out, LANE)       # VMEM lane padding of the out tile
    # Bytes that scale with TB: double-buffered x tile + double-buffered out tile.
    per_row = (2 * hid_lanes + 2 * out_lanes) * 4
    # Resident weights/biases; budget as if double-buffered (covers fallback).
    weight_bytes = 2 * (_round_up(hidden, 8) * LANE          # W4.T
                        + LANE * out_lanes                   # W56.T
                        + 8 * LANE + 8 * out_lanes) * 4      # biases
    budget = 28 << 20        # conservative: fits v7x's 64 MiB VMEM with headroom
    tb_vmem = max(8, ((budget - weight_bytes) // per_row) // 8 * 8)
    # TODO(synk): if hidden were ever so large that tb_vmem hits 8, add a K
    #             (hidden) grid axis with a VMEM accumulator; unnecessary here.
    # Aim for >= 2 grid steps so v7x's two TensorCores both get a tile.
    tb_two = max(8, _round_up(pl.cdiv(B, 2), 8))
    TB = max(8, min(max_tb, tb_vmem, tb_two))
    TB = min(TB, _round_up(B, 8))            # never larger than the batch
    used = TB * per_row + weight_bytes
    vmem_limit = int(min(max(2 * used, 8 << 20), 48 << 20))
    return TB, vmem_limit


def infer_specformer_forward(x, params, max_tb=4096):
    """x: (B, hidden_size) float32.  Returns (B, n_outputs) float32."""
    w4, b4, w5, b5, w6, b6 = (params["w4"], params["b4"], params["w5"],
                              params["b5"], params["w6"], params["b6"])
    B, hidden = x.shape
    n_out = w4.shape[0]
    assert n_out <= LANE, "n_outputs > 128 would need wider in-kernel padding"

    # --- wrapper-side algebra (one-time, trace-level) ------------------------
    # Fold fc5 and fc6 (no nonlinearity between them):
    #   fc6(fc5(h)) = h @ (W6 @ W5).T + (b5 @ W6.T + b6)
    w56 = w6 @ w5                                   # (n_out, n_out)
    b56 = b5 @ w6.T + b6                            # (1, n_out)

    # Pre-transpose; pad only the in-kernel intermediate width to LANE with
    # zeros (exact).  The HBM-facing output stays (B, n_out).
    w4t_p = jnp.zeros((hidden, LANE), jnp.float32).at[:, :n_out].set(w4.T)
    b4_p = jnp.zeros((1, LANE), jnp.float32).at[:, :n_out].set(b4)
    w56t_p = jnp.zeros((LANE, n_out), jnp.float32).at[:n_out, :].set(w56.T)

    # --- batch tiling (no wrapper pad, no post-kernel slice) ------------------
    TB, vmem_limit = _derive_tile(B, hidden, n_out, max_tb)
    grid = (pl.cdiv(B, TB),)   # ragged last block: reads padded, writes masked

    cost = pl.CostEstimate(
        flops=2 * B * hidden * LANE + 2 * B * LANE * n_out + 3 * B * LANE,
        transcendentals=0,
        bytes_accessed=(B * hidden + B * n_out) * 4
        + (hidden * LANE + LANE * n_out + LANE + n_out) * 4,
    )

    out = pl.pallas_call(
        _specformer_kernel,
        out_shape=jax.ShapeDtypeStruct((B, n_out), jnp.float32),
        grid=grid,
        in_specs=[
            pl.BlockSpec((TB, hidden), lambda i: (i, 0)),   # streamed x
            _resident_spec((hidden, LANE)),                 # W4.T (resident)
            _resident_spec((1, LANE)),                      # b4   (resident)
            _resident_spec((LANE, n_out)),                  # W56.T (resident)
            _resident_spec((1, n_out)),                     # b56  (resident)
        ],
        out_specs=pl.BlockSpec((TB, n_out), lambda i: (i, 0)),
        compiler_params=pltpu.CompilerParams(
            dimension_semantics=("parallel",),
            vmem_limit_bytes=vmem_limit),
        cost_estimate=cost,
    )(x, w4t_p, b4_p, w56t_p, b56)

    return out


def make_params(hidden_size, n_outputs, key):
    """Deterministic parameter init (PyTorch Linear-style uniform bounds)."""
    ks = jax.random.split(key, 6)

    def linear(kw, kb, fan_in, fan_out):
        bound = 1.0 / (fan_in ** 0.5)
        w = jax.random.uniform(kw, (fan_out, fan_in), jnp.float32, -bound, bound)
        b = jax.random.uniform(kb, (1, fan_out), jnp.float32, -bound, bound)
        return w, b

    w4, b4 = linear(ks[0], ks[1], hidden_size, n_outputs)   # fc4
    w5, b5 = linear(ks[2], ks[3], n_outputs, n_outputs)     # fc5 (synthesized)
    w6, b6 = linear(ks[4], ks[5], n_outputs, n_outputs)     # fc6 (synthesized)
    return {"w4": w4, "b4": b4, "w5": w5, "b5": b5, "w6": w6, "b6": b6}


def reference_forward(x, params):
    """Pure-JAX reference mirroring the PyTorch forward (unfolded)."""
    h = x @ params["w4"].T + params["b4"]
    h = jnp.where(h > 0, h, NEG_SLOPE * h)
    h = h @ params["w5"].T + params["b5"]
    h = h @ params["w6"].T + params["b6"]
    return h


if __name__ == "__main__":
    # Small shapes consistent with the module: batch=8, hidden_size=32,
    # n_outputs=8.
    B, hidden_size, n_outputs = 8, 32, 8

    key = jax.random.PRNGKey(0)
    kx, kp = jax.random.split(key)
    x = jax.random.normal(kx, (B, hidden_size), dtype=jnp.float32)
    params = make_params(hidden_size, n_outputs, kp)

    out = infer_specformer_forward(x, params)
    out = jax.block_until_ready(out)

    ref = reference_forward(x, params)
    assert out.shape == (B, n_outputs), out.shape
    assert jnp.allclose(out, ref, atol=1e-4, rtol=1e-4), (
        float(jnp.max(jnp.abs(out - ref))))

    print("KERNEL_OK")
</pallas_src>

<mosaic_0001>
module attributes {stable_mosaic.version = 11 : i64} {
  func.func @_specformer_kernel(%arg0: i32, %arg1: memref<8x32xf32, #tpu.memory_space<vmem>>, %arg2: memref<32x128xf32, #tpu.memory_space<vmem>>, %arg3: memref<1x128xf32, #tpu.memory_space<vmem>>, %arg4: memref<128x8xf32, #tpu.memory_space<vmem>>, %arg5: memref<1x8xf32, #tpu.memory_space<vmem>>, %arg6: memref<8x8xf32, #tpu.memory_space<vmem>>) attributes {dimension_semantics = [#tpu.dimension_semantics<parallel>], iteration_bounds = array<i64: 1>, scalar_prefetch = 0 : i64, scratch_operands = 0 : i64, tpu.core_type = #tpu.core_type<tc>, window_params = [{transform_indices = @transform_0, window_bounds = array<i64: 8, 32>}, {pipeline_mode = #tpu.pipeline_mode<synchronous>, transform_indices = @transform_1, window_bounds = array<i64: 32, 128>}, {pipeline_mode = #tpu.pipeline_mode<synchronous>, transform_indices = @transform_2, window_bounds = array<i64: 1, 128>}, {pipeline_mode = #tpu.pipeline_mode<synchronous>, transform_indices = @transform_3, window_bounds = array<i64: 128, 8>}, {pipeline_mode = #tpu.pipeline_mode<synchronous>, transform_indices = @transform_4, window_bounds = array<i64: 1, 8>}, {transform_indices = @transform_5, window_bounds = array<i64: 8, 8>}]} {
    %c0 = arith.constant 0 : index
    %c0_0 = arith.constant 0 : index
    %0 = vector.load %arg1[%c0, %c0_0] : memref<8x32xf32, #tpu.memory_space<vmem>>, vector<8x32xf32>
    %c0_1 = arith.constant 0 : index
    %c0_2 = arith.constant 0 : index
    %1 = vector.load %arg2[%c0_1, %c0_2] : memref<32x128xf32, #tpu.memory_space<vmem>>, vector<32x128xf32>
    %cst = arith.constant dense<0.000000e+00> : vector<8x128xf32>
    %2 = tpu.matmul %0, %1, %cst {dimension_numbers = #tpu.dot_dimension_numbers<[1], [0], [0], [1], [0, 0, 1, 1], [], []>} : vector<8x32xf32>, vector<32x128xf32>, vector<8x128xf32> -> vector<8x128xf32>
    %c0_3 = arith.constant 0 : index
    %c0_4 = arith.constant 0 : index
    %3 = vector.load %arg3[%c0_3, %c0_4] : memref<1x128xf32, #tpu.memory_space<vmem>>, vector<1x128xf32>
    %4 = vector.broadcast %3 : vector<1x128xf32> to vector<8x128xf32>
    %5 = arith.addf %2, %4 : vector<8x128xf32>
    %cst_5 = arith.constant 0.000000e+00 : f32
    %6 = vector.broadcast %cst_5 : f32 to vector<8x128xf32>
    %7 = arith.cmpf ogt, %5, %6 : vector<8x128xf32>
    %cst_6 = arith.constant 0.00999999977 : f32
    %8 = vector.broadcast %cst_6 : f32 to vector<8x128xf32>
    %9 = arith.mulf %8, %5 : vector<8x128xf32>
    %10 = arith.select %7, %5, %9 : vector<8x128xi1>, vector<8x128xf32>
    %c0_7 = arith.constant 0 : index
    %c0_8 = arith.constant 0 : index
    %11 = vector.load %arg4[%c0_7, %c0_8] : memref<128x8xf32, #tpu.memory_space<vmem>>, vector<128x8xf32>
    %cst_9 = arith.constant dense<0.000000e+00> : vector<8x8xf32>
    %12 = tpu.matmul %10, %11, %cst_9 {dimension_numbers = #tpu.dot_dimension_numbers<[1], [0], [0], [1], [0, 0, 1, 1], [], []>} : vector<8x128xf32>, vector<128x8xf32>, vector<8x8xf32> -> vector<8x8xf32>
    %c0_10 = arith.constant 0 : index
    %c0_11 = arith.constant 0 : index
    %13 = vector.load %arg5[%c0_10, %c0_11] : memref<1x8xf32, #tpu.memory_space<vmem>>, vector<1x8xf32>
    %14 = vector.broadcast %13 : vector<1x8xf32> to vector<8x8xf32>
    %15 = arith.addf %12, %14 : vector<8x8xf32>
    %c0_12 = arith.constant 0 : index
    %c0_13 = arith.constant 0 : index
    %16 = vector.load %arg6[%c0_12, %c0_13] : memref<8x8xf32, #tpu.memory_space<vmem>>, vector<8x8xf32>
    tpu.vector_store %arg6[%c0_12, %c0_13], %15 {strides = array<i32>} : memref<8x8xf32, #tpu.memory_space<vmem>>, vector<8x8xf32>,
    return
  }
  func.func @transform_0(%arg0: i32) -> (i32, i32) {
    %c0_i32 = arith.constant 0 : i32
    %c0_i32_0 = arith.constant 0 : i32
    return %arg0, %c0_i32 : i32, i32
  }
  func.func @transform_1(%arg0: i32) -> (i32, i32) {
    %c0_i32 = arith.constant 0 : i32
    %c0_i32_0 = arith.constant 0 : i32
    %c0_i32_1 = arith.constant 0 : i32
    return %c0_i32, %c0_i32_0 : i32, i32
  }
  func.func @transform_2(%arg0: i32) -> (i32, i32) {
    %c0_i32 = arith.constant 0 : i32
    %c0_i32_0 = arith.constant 0 : i32
    %c0_i32_1 = arith.constant 0 : i32
    return %c0_i32, %c0_i32_0 : i32, i32
  }
  func.func @transform_3(%arg0: i32) -> (i32, i32) {
    %c0_i32 = arith.constant 0 : i32
    %c0_i32_0 = arith.constant 0 : i32
    %c0_i32_1 = arith.constant 0 : i32
    return %c0_i32, %c0_i32_0 : i32, i32
  }
  func.func @transform_4(%arg0: i32) -> (i32, i32) {
    %c0_i32 = arith.constant 0 : i32
    %c0_i32_0 = arith.constant 0 : i32
    %c0_i32_1 = arith.constant 0 : i32
    return %c0_i32, %c0_i32_0 : i32, i32
  }
  func.func @transform_5(%arg0: i32) -> (i32, i32) {
    %c0_i32 = arith.constant 0 : i32
    %c0_i32_0 = arith.constant 0 : i32
    return %arg0, %c0_i32 : i32, i32
  }
}

</mosaic_0001>

<bundles_post_ra>
// kernel: tpu_custom_call.1
= control target key start
LH: loop header
LB: loop body
LE: loop exit
PB: predicated region body
PF: predicated region fallthrough
CT: control target
= control target key end

     0   :  { %vm30_vm0 = vcmask 261120   ;;  %s248_s0 = inlined_call_operand.vmem [shape: f32[8,32], index: 0, kind: input, shape index: {}]   ;;  %s249_s1 = inlined_call_operand.vmem [shape: f32[32,128], index: 1, kind: input, shape index: {}]   ;;  %s250_s2 = inlined_call_operand.vmem [shape: f32[1,128], index: 2, kind: input, shape index: {}]   ;;  %s251_s3 = inlined_call_operand.vmem [shape: f32[128,8], index: 3, kind: input, shape index: {}]   ;;  %s252_s4 = inlined_call_operand.vmem [shape: f32[1,8], index: 4, kind: input, shape index: {}]   ;;  %s253_s5 = inlined_call_operand.hbm [shape: f32[8,8], index: 5, kind: output, shape index: {}]  }
   0x1   :  { %v25_v0 = vld [vmem:[%s249_s1 + $0x18] sm:$0xff]  ;;  %v24_v1 = vld [vmem:[%s249_s1 + $0x10] sm:$0xff]  ;;  %v23_v3 = vld [vmem:[%s249_s1 + $0x8] sm:$0xff] }
   0x2   :  { %46 = vmatpush.msra.mxu0 %v25_v0  ;;  %v72_v2 = vld [vmem:[%s251_s3 + $0x78] sm:$0xff]  ;;  %v71_v4 = vld [vmem:[%s251_s3 + $0x70] sm:$0xff]  ;;  %v70_v5 = vld [vmem:[%s251_s3 + $0x68] sm:$0xff] }
   0x3   :  { %77 = vmatpush.msra.mxu1 %v72_v2  ;;  %v22_v6 = vld [vmem:[%s249_s1] sm:$0xff]  ;;  %v68_v9 = vld [vmem:[%s251_s3 + $0x58] sm:$0xff] }
   0x4   :  { %47 = vmatpush.msra.mxu0 %v24_v1  ;;  %v21_v7 = vld [vmem:[%s248_s0] sm:$0xff] }
   0x5   :  { %78 = vmatpush.msra.mxu1 %v71_v4  ;;  %v69_v8 = vld [vmem:[%s251_s3 + $0x60] sm:$0xff] }
   0x6   :  { %48 = vmatpush.msra.mxu0 %v23_v3 }
   0x7   :  { %79 = vmatpush.msra.mxu1 %v70_v5 }
   0x8   :  { %49 = vmatpush.msra.mxu0 %v22_v6 }
   0x9   :  { %10 = vsyncpa [#allocation3], 0  ;;  %115 = vmatmul.msk.f32.vlgmr.msra.gmra.mxu0 %vm30_vm0, %v21_v7  ;;  %80 = vmatpush.msra.mxu1 %v69_v8  ;;  %v67_v10 = vld [vmem:[%s251_s3 + $0x50] sm:$0xff]  ;;  %v66_v11 = vld [vmem:[%s251_s3 + $0x48] sm:$0xff]  ;;  %s145_s12 = smov [#allocation2]   ;;  %s106_s0 = sshll.u32 %s253_s5, 4  ;;  %s107_s0 = int_to_ptr.hbm [resolvable:$true] %s106_s0 }
   0xa   :  { %v65_v12 = vld [vmem:[%s251_s3 + $0x40] sm:$0xff]  ;;  %v64_v13 = vld [vmem:[%s251_s3 + $0x38] sm:$0xff]  ;;  %v63_v14 = vld [vmem:[%s251_s3 + $0x30] sm:$0xff]  ;;  %s104_s1 = sshll.u32 %s145_s12, 4  ;;  %vm97_vm2 = vcmask 64512   ;;  %s105_s1 = int_to_ptr.vmem [resolvable:$true] %s104_s1 }
   0xb   :  { %81 = vmatpush.msra.mxu1 %v68_v9  ;;  %v62_v15 = vld [vmem:[%s251_s3 + $0x28] sm:$0xff]  ;;  %v61_v16 = vld [vmem:[%s251_s3 + $0x20] sm:$0xff]  ;;  %v60_v17 = vld [vmem:[%s251_s3 + $0x18] sm:$0xff] }
   0xc   :  { %v59_v18 = vld [vmem:[%s251_s3 + $0x10] sm:$0xff]  ;;  %v58_v19 = vld [vmem:[%s251_s3 + $0x8] sm:$0xff]  ;;  %v57_v20 = vld [vmem:[%s251_s3] sm:$0xff] }
   0xd   :  { %82 = vmatpush.msra.mxu1 %v67_v10  ;;  %v117_v21 = vld [vmem:[%s250_s2] ss:$0 sm:$0xff] }
   0xe   :  { %v118_v26 = vld [vmem:[%s252_s4] ss:$0 sm:$0xff] }
   0xf   :  { %83 = vmatpush.msra.mxu1 %v66_v11 }
  0x11   :  { %84 = vmatpush.msra.mxu1 %v65_v12 }
  0x13   :  { %85 = vmatpush.msra.mxu1 %v64_v13 }
  0x15   :  { %86 = vmatpush.msra.mxu1 %v63_v14 }
  0x17   :  { %87 = vmatpush.msra.mxu1 %v62_v15 }
  0x19   :  { %88 = vmatpush.msra.mxu1 %v61_v16 }
  0x1b   :  { %89 = vmatpush.msra.mxu1 %v60_v17 }
  0x1d   :  { %90 = vmatpush.msra.mxu1 %v59_v18 }
  0x1f   :  { %91 = vmatpush.msra.mxu1 %v58_v19 }
  0x21   :  { %92 = vmatpush.msra.mxu1 %v57_v20 }
  0x86   :  { %v51_v22 = vpop.f32.mrf.mxu0 }
  0x87   :  { %v52_v23 = vadd.f32 %v117_v21, %v51_v22 }
  0x89   :  { %vm54_vm1 = vcmp.gt.f32.partialorder %v52_v23, 0.0  ;;  %v55_v24 = vmul.f32 0.01, %v52_v23 }
  0x8b   :  { %v56_v25 = vsel %vm54_vm1, %v52_v23, %v55_v24 }
  0x8c   :  { %93 = vmatmul.f32.vlgmr.msra.gmra.mxu1 %v56_v25 }
 0x109   :  { %v94_v27 = vpop.f32.mrf.mxu1 }
 0x10a   :  { %v95_v28 = vadd.f32 %v118_v26, %v94_v27 }
 0x10c   :  { %98 = vst.msk [vmem:[#allocation2] sm:$0xff] %vm97_vm2, %v95_v28 }
 0x10d   :  { %109 = dma.vmem_to_hbm [thread:$0]  %s105_s1, 128, %s107_s0, [#allocation3]  }
 0x10e   :  { %143 = dma.done.wait [#allocation3], 128  }
 0x10f   :  { %144 = vsyncadd [#allocation3], 4294967168 }
 0x110   :  { %114 = vsyncpa [#allocation3], 1 }

</bundles_post_ra>
